<compile_context>
chip_gen: v6e
topology: v6e:2x2x1
jax: 0.10.0
libtpu: 0.0.40
codegen_flags: <defaults>
</compile_context>

<pallas_src>
import jax
import jax.numpy as jnp
from jax import lax
from jax.experimental import pallas as pl
from jax.experimental.pallas import tpu as pltpu

LANE = 128


def _round_up(n, m):
    return ((n + m - 1) // m) * m


# ----------------------------------------------------------------------------
# One-shot weight prep (XLA): fold rotations into the head weights and build
# the pre-transposed, lane-padded slabs the fused kernel consumes.
#   W_eff_i = Wh_i @ R_i                (O, D)
#   w_all_t[:, t*O:(t+1)*O] = W_eff_t.T (D, P),  P = round_up(T*O, 128)
# Hoist this out of the hot path when rotations / heads are static.
# ----------------------------------------------------------------------------
def prepare_weights(params, compute_dtype=jnp.float32):
    wb, bb = params["wb"], params["bb"]
    wh, bh, rotations = params["wh"], params["bh"], params["rotations"]
    D, D_in = wb.shape
    T, O, _ = wh.shape
    P = _round_up(T * O, LANE)

    w_eff = jnp.einsum("tod,tde->toe", wh, rotations,
                       precision=lax.Precision.HIGHEST)            # (T, O, D)
    w_all_t = jnp.zeros((D, P), jnp.float32).at[:, : T * O].set(
        w_eff.reshape(T * O, D).T)                                  # (D, P)
    b_all = jnp.zeros((1, P), jnp.float32).at[:, : T * O].set(
        bh.reshape(1, T * O))                                       # (1, P)
    wb_t = wb.T                                                     # (D_in, D)

    return {
        "wb_t": wb_t.astype(compute_dtype),
        "bb": bb.astype(jnp.float32),
        "w_all_t": w_all_t.astype(compute_dtype),
        "b_all": b_all,
        "dims": (D_in, D, P, T, O),
        "compute_dtype": compute_dtype,
    }


# ----------------------------------------------------------------------------
# Fused forward kernel: backbone + all task heads, accumulated over the
# (optional) K-tiling of the representation dim directly in the resident
# f32 output block.
#   rep_k  = relu(x @ wb_t[:, k]  + bb[k])            (tb, dk)
#   out   += rep_k @ w_all_t[k, :]                    (tb, P)
#   out   += b_all                      (on the last k step)
# ----------------------------------------------------------------------------
def fused_kernel(x_ref, wbt_ref, bb_ref, wallt_ref, ball_ref, out_ref):
    k = pl.program_id(1)

    @pl.when(k == 0)
    def _init():
        out_ref[...] = jnp.zeros_like(out_ref)

    rep = jnp.dot(x_ref[...], wbt_ref[...], preferred_element_type=jnp.float32)
    rep = jnp.maximum(rep + bb_ref[...], 0.0)
    out_ref[...] += jnp.dot(rep.astype(wallt_ref.dtype), wallt_ref[...],
                            preferred_element_type=jnp.float32)

    @pl.when(k == pl.num_programs(1) - 1)
    def _finalize():
        out_ref[...] = out_ref[...] + ball_ref[...]


def _vmem_limit_bytes(tb, d_in, dk, p, in_itemsize, weight_bufs):
    io = 2 * tb * d_in * in_itemsize + 2 * tb * p * 4        # double-buffered x / out
    w = weight_bufs * (d_in * dk + dk * p) * in_itemsize     # resident weight slabs
    bias = weight_bufs * 8 * (dk + p) * 4                    # sublane-padded biases
    total = int(1.5 * (io + w + bias)) + (4 << 20)           # layout + internal slack
    return max(16 << 20, min(total, 64 << 20))               # valid on v5e/v6e/v7x


def rotograd_forward(x, params=None, *, prepared=None, compute_dtype=jnp.float32):
    if prepared is None:
        prepared = prepare_weights(params, compute_dtype)

    wb_t, bb = prepared["wb_t"], prepared["bb"]
    w_all_t, b_all = prepared["w_all_t"], prepared["b_all"]
    D_in, D, P, T, O = prepared["dims"]
    cdt = prepared["compute_dtype"]

    # --- batch: pad to a fixed MXU-filling tile, never divisor-hunt ----------
    # 128 rows for modest B (also gives >=2 tiles -> both v7x TCs at B in
    # (128, 256]); 256 rows at scale to fill the v6e/v7x MXU.
    B = x.shape[0]
    tb = 128 if B <= 256 else 256
    B_pad = _round_up(B, tb)
    x_pad = jnp.zeros((B_pad, D_in), cdt).at[:B].set(x.astype(cdt))

    # --- optional K-tiling of the representation dim (large D / v7x VMEM) ----
    dk = D
    if D > 512:
        for cand in (512, 256, 128):
            if D % cand == 0:
                dk = cand
                break
    nb, nk = B_pad // tb, D // dk

    def _spec(shape, imap, *, single):
        if single:
            return pl.BlockSpec(shape, imap, pipeline_mode=pl.Buffered(1))
        return pl.BlockSpec(shape, imap)

    def _call(single_buffer):
        const_w = single_buffer and nk == 1     # weights constant across the grid
        in_specs = [
            pl.BlockSpec((tb, D_in), lambda i, k: (i, 0)),          # x tile
            _spec((D_in, dk), lambda i, k: (0, k), single=const_w),  # backbone W.T
            _spec((1, dk), lambda i, k: (0, k), single=const_w),     # backbone bias
            _spec((dk, P), lambda i, k: (k, 0), single=const_w),     # stacked head W.T
            _spec((1, P), lambda i, k: (0, 0), single=single_buffer)  # stacked head bias
        ]
        weight_bufs = 1 if const_w else 2
        return pl.pallas_call(
            fused_kernel,
            out_shape=jax.ShapeDtypeStruct((B_pad, P), jnp.float32),
            grid_spec=pltpu.PrefetchScalarGridSpec(
                num_scalar_prefetch=0,
                grid=(nb, nk),
                in_specs=in_specs,
                out_specs=pl.BlockSpec((tb, P), lambda i, k: (i, 0)),
            ),
            compiler_params=pltpu.CompilerParams(
                dimension_semantics=("parallel", "arbitrary"),
                vmem_limit_bytes=_vmem_limit_bytes(
                    tb, D_in, dk, P, jnp.dtype(cdt).itemsize, weight_bufs),
            ),
        )(x_pad, wb_t, bb, w_all_t, b_all)

    try:
        out = _call(True)
    except Exception:
        # pipeline_mode=pl.Buffered(1) unsupported on this jax build: fall back
        # to default double-buffering (correctness identical).
        out = _call(False)

    # Un-pad batch + lanes, split back into the per-task prediction list.
    return [out[:B, t * O:(t + 1) * O] for t in range(T)]


# ----------------------------------------------------------------------------
# Parameter construction + pure-JAX reference
# ----------------------------------------------------------------------------
def make_params(key, d_in, input_size, out_dim, num_tasks):
    k1, k2, k3, k4 = jax.random.split(key, 4)
    wb = jax.random.normal(k1, (input_size, d_in), jnp.float32) * 0.1
    bb = jax.random.normal(k2, (1, input_size), jnp.float32) * 0.1
    wh = jax.random.normal(k3, (num_tasks, out_dim, input_size), jnp.float32) * 0.1
    bh = jax.random.normal(k4, (num_tasks, 1, out_dim), jnp.float32) * 0.1
    # rotation_i initialized to eye(input_size), as in the PyTorch __init__.
    rotations = jnp.broadcast_to(
        jnp.eye(input_size, dtype=jnp.float32),
        (num_tasks, input_size, input_size),
    )
    return {"wb": wb, "bb": bb, "wh": wh, "bh": bh, "rotations": rotations}


def reference_forward(x, params):
    rep = jnp.maximum(x @ params["wb"].T + params["bb"], 0.0)
    preds = []
    for i in range(params["rotations"].shape[0]):
        z = jnp.einsum("ij,bj->bi", params["rotations"][i], rep)
        preds.append(z @ params["wh"][i].T + params["bh"][i])
    return preds


if __name__ == "__main__":
    B, D_IN, INPUT_SIZE, OUT_DIM, NUM_TASKS = 8, 32, 32, 16, 3

    key = jax.random.PRNGKey(0)
    kx, kp, kr = jax.random.split(key, 3)
    x = jax.random.normal(kx, (B, D_IN), jnp.float32)
    params = make_params(kp, D_IN, INPUT_SIZE, OUT_DIM, NUM_TASKS)

    # ---- check 1: module defaults (identity rotations), f32 -----------------
    preds = rotograd_forward(x, params)
    preds = [jax.block_until_ready(p) for p in preds]
    refs = reference_forward(x, params)
    for p, r in zip(preds, refs):
        assert p.shape == (B, OUT_DIM)
        assert jnp.allclose(p, r, atol=1e-5, rtol=1e-5)

    # ---- check 2: random orthogonal rotations, prep hoisted out of the call -
    q, _ = jnp.linalg.qr(
        jax.random.normal(kr, (NUM_TASKS, INPUT_SIZE, INPUT_SIZE), jnp.float32)
    )
    params_rot = dict(params, rotations=q.astype(jnp.float32))
    prepared = prepare_weights(params_rot)          # one-shot prep (inference path)
    preds2 = rotograd_forward(x, prepared=prepared)
    preds2 = [jax.block_until_ready(p) for p in preds2]
    refs2 = reference_forward(x, params_rot)
    for p, r in zip(preds2, refs2):
        assert p.shape == (B, OUT_DIM)
        assert jnp.allclose(p, r, atol=1e-5, rtol=1e-5)

    # ---- check 3: bf16 compute path (v6e/v7x MXU rate), loose tolerance -----
    preds3 = rotograd_forward(x, params_rot, compute_dtype=jnp.bfloat16)
    preds3 = [jax.block_until_ready(p) for p in preds3]
    for p, r in zip(preds3, refs2):
        assert p.shape == (B, OUT_DIM)
        assert float(jnp.max(jnp.abs(p - r))) < 1e-1

    print("KERNEL_OK")
</pallas_src>

<mosaic_0001>
module attributes {stable_mosaic.version = 11 : i64} {
  func.func @fused_kernel(%arg0: i32, %arg1: i32, %arg2: memref<128x32xf32, #tpu.memory_space<vmem>>, %arg3: memref<32x32xf32, #tpu.memory_space<vmem>>, %arg4: memref<1x32xf32, #tpu.memory_space<vmem>>, %arg5: memref<32x128xf32, #tpu.memory_space<vmem>>, %arg6: memref<1x128xf32, #tpu.memory_space<vmem>>, %arg7: memref<128x128xf32, #tpu.memory_space<vmem>>) attributes {dimension_semantics = [#tpu.dimension_semantics<parallel>, #tpu.dimension_semantics<arbitrary>], iteration_bounds = array<i64: 1, 1>, scalar_prefetch = 0 : i64, scratch_operands = 0 : i64, tpu.core_type = #tpu.core_type<tc>, window_params = [{transform_indices = @transform_0, window_bounds = array<i64: 128, 32>}, {pipeline_mode = #tpu.pipeline_mode<synchronous>, transform_indices = @transform_1, window_bounds = array<i64: 32, 32>}, {pipeline_mode = #tpu.pipeline_mode<synchronous>, transform_indices = @transform_2, window_bounds = array<i64: 1, 32>}, {pipeline_mode = #tpu.pipeline_mode<synchronous>, transform_indices = @transform_3, window_bounds = array<i64: 32, 128>}, {pipeline_mode = #tpu.pipeline_mode<synchronous>, transform_indices = @transform_4, window_bounds = array<i64: 1, 128>}, {transform_indices = @transform_5, window_bounds = array<i64: 128, 128>}]} {
    %c0_i32 = arith.constant 0 : i32
    %0 = arith.cmpi eq, %arg1, %c0_i32 : i32
    %1 = arith.extui %0 : i1 to i32
    %c0_i32_0 = arith.constant 0 : i32
    %2 = arith.cmpi ne, %1, %c0_i32_0 : i32
    scf.if %2 {
      %cst_16 = arith.constant 0.000000e+00 : f32
      %19 = vector.broadcast %cst_16 : f32 to vector<128x128xf32>
      %c0_17 = arith.constant 0 : index
      %c0_18 = arith.constant 0 : index
      %20 = vector.load %arg7[%c0_17, %c0_18] : memref<128x128xf32, #tpu.memory_space<vmem>>, vector<128x128xf32>
      tpu.vector_store %arg7[%c0_17, %c0_18], %19 {strides = array<i32>} : memref<128x128xf32, #tpu.memory_space<vmem>>, vector<128x128xf32>,
    } else {
    }
    %c0 = arith.constant 0 : index
    %c0_1 = arith.constant 0 : index
    %3 = vector.load %arg2[%c0, %c0_1] : memref<128x32xf32, #tpu.memory_space<vmem>>, vector<128x32xf32>
    %c0_2 = arith.constant 0 : index
    %c0_3 = arith.constant 0 : index
    %4 = vector.load %arg3[%c0_2, %c0_3] : memref<32x32xf32, #tpu.memory_space<vmem>>, vector<32x32xf32>
    %cst = arith.constant dense<0.000000e+00> : vector<128x32xf32>
    %5 = tpu.matmul %3, %4, %cst {dimension_numbers = #tpu.dot_dimension_numbers<[1], [0], [0], [1], [0, 0, 1, 1], [], []>} : vector<128x32xf32>, vector<32x32xf32>, vector<128x32xf32> -> vector<128x32xf32>
    %c0_4 = arith.constant 0 : index
    %c0_5 = arith.constant 0 : index
    %6 = vector.load %arg4[%c0_4, %c0_5] : memref<1x32xf32, #tpu.memory_space<vmem>>, vector<1x32xf32>
    %7 = vector.broadcast %6 : vector<1x32xf32> to vector<128x32xf32>
    %8 = arith.addf %5, %7 : vector<128x32xf32>
    %cst_6 = arith.constant 0.000000e+00 : f32
    %9 = vector.broadcast %cst_6 : f32 to vector<128x32xf32>
    %10 = arith.maximumf %8, %9 : vector<128x32xf32>
    %c0_7 = arith.constant 0 : index
    %c0_8 = arith.constant 0 : index
    %11 = vector.load %arg7[%c0_7, %c0_8] : memref<128x128xf32, #tpu.memory_space<vmem>>, vector<128x128xf32>
    %c0_9 = arith.constant 0 : index
    %c0_10 = arith.constant 0 : index
    %12 = vector.load %arg5[%c0_9, %c0_10] : memref<32x128xf32, #tpu.memory_space<vmem>>, vector<32x128xf32>
    %cst_11 = arith.constant dense<0.000000e+00> : vector<128x128xf32>
    %13 = tpu.matmul %10, %12, %cst_11 {dimension_numbers = #tpu.dot_dimension_numbers<[1], [0], [0], [1], [0, 0, 1, 1], [], []>} : vector<128x32xf32>, vector<32x128xf32>, vector<128x128xf32> -> vector<128x128xf32>
    %14 = arith.addf %11, %13 : vector<128x128xf32>
    %c0_12 = arith.constant 0 : index
    %c0_13 = arith.constant 0 : index
    %15 = vector.load %arg7[%c0_12, %c0_13] : memref<128x128xf32, #tpu.memory_space<vmem>>, vector<128x128xf32>
    tpu.vector_store %arg7[%c0_12, %c0_13], %14 {strides = array<i32>} : memref<128x128xf32, #tpu.memory_space<vmem>>, vector<128x128xf32>,
    %c0_i32_14 = arith.constant 0 : i32
    %16 = arith.cmpi eq, %arg1, %c0_i32_14 : i32
    %17 = arith.extui %16 : i1 to i32
    %c0_i32_15 = arith.constant 0 : i32
    %18 = arith.cmpi ne, %17, %c0_i32_15 : i32
    scf.if %18 {
      %c0_16 = arith.constant 0 : index
      %c0_17 = arith.constant 0 : index
      %19 = vector.load %arg7[%c0_16, %c0_17] : memref<128x128xf32, #tpu.memory_space<vmem>>, vector<128x128xf32>
      %c0_18 = arith.constant 0 : index
      %c0_19 = arith.constant 0 : index
      %20 = vector.load %arg6[%c0_18, %c0_19] : memref<1x128xf32, #tpu.memory_space<vmem>>, vector<1x128xf32>
      %21 = vector.broadcast %20 : vector<1x128xf32> to vector<128x128xf32>
      %22 = arith.addf %19, %21 : vector<128x128xf32>
      %c0_20 = arith.constant 0 : index
      %c0_21 = arith.constant 0 : index
      %23 = vector.load %arg7[%c0_20, %c0_21] : memref<128x128xf32, #tpu.memory_space<vmem>>, vector<128x128xf32>
      tpu.vector_store %arg7[%c0_20, %c0_21], %22 {strides = array<i32>} : memref<128x128xf32, #tpu.memory_space<vmem>>, vector<128x128xf32>,
    } else {
    }
    return
  }
  func.func @transform_0(%arg0: i32, %arg1: i32) -> (i32, i32) {
    %c0_i32 = arith.constant 0 : i32
    %c0_i32_0 = arith.constant 0 : i32
    return %arg0, %c0_i32 : i32, i32
  }
  func.func @transform_1(%arg0: i32, %arg1: i32) -> (i32, i32) {
    %c0_i32 = arith.constant 0 : i32
    %c0_i32_0 = arith.constant 0 : i32
    return %c0_i32, %arg1 : i32, i32
  }
  func.func @transform_2(%arg0: i32, %arg1: i32) -> (i32, i32) {
    %c0_i32 = arith.constant 0 : i32
    %c0_i32_0 = arith.constant 0 : i32
    return %c0_i32, %arg1 : i32, i32
  }
  func.func @transform_3(%arg0: i32, %arg1: i32) -> (i32, i32) {
    %c0_i32 = arith.constant 0 : i32
    %c0_i32_0 = arith.constant 0 : i32
    return %arg1, %c0_i32 : i32, i32
  }
  func.func @transform_4(%arg0: i32, %arg1: i32) -> (i32, i32) {
    %c0_i32 = arith.constant 0 : i32
    %c0_i32_0 = arith.constant 0 : i32
    %c0_i32_1 = arith.constant 0 : i32
    return %c0_i32, %c0_i32_0 : i32, i32
  }
  func.func @transform_5(%arg0: i32, %arg1: i32) -> (i32, i32) {
    %c0_i32 = arith.constant 0 : i32
    %c0_i32_0 = arith.constant 0 : i32
    return %arg0, %c0_i32 : i32, i32
  }
}

module attributes {stable_mosaic.version = 11 : i64} {
  func.func @fused_kernel(%arg0: i32, %arg1: i32, %arg2: memref<128x32xf32, #tpu.memory_space<vmem>>, %arg3: memref<32x32xf32, #tpu.memory_space<vmem>>, %arg4: memref<1x32xf32, #tpu.memory_space<vmem>>, %arg5: memref<32x128xf32, #tpu.memory_space<vmem>>, %arg6: memref<1x128xf32, #tpu.memory_space<vmem>>, %arg7: memref<128x128xf32, #tpu.memory_space<vmem>>) attributes {dimension_semantics = [#tpu.dimension_semantics<parallel>, #tpu.dimension_semantics<arbitrary>], iteration_bounds = array<i64: 1, 1>, scalar_prefetch = 0 : i64, scratch_operands = 0 : i64, tpu.core_type = #tpu.core_type<tc>, window_params = [{transform_indices = @transform_0, window_bounds = array<i64: 128, 32>}, {transform_indices = @transform_1, window_bounds = array<i64: 32, 32>}, {transform_indices = @transform_2, window_bounds = array<i64: 1, 32>}, {transform_indices = @transform_3, window_bounds = array<i64: 32, 128>}, {pipeline_mode = #tpu.pipeline_mode<synchronous>, transform_indices = @transform_4, window_bounds = array<i64: 1, 128>}, {transform_indices = @transform_5, window_bounds = array<i64: 128, 128>}]} {
    %c0_i32 = arith.constant 0 : i32
    %0 = arith.cmpi eq, %arg1, %c0_i32 : i32
    %1 = arith.extui %0 : i1 to i32
    %c0_i32_0 = arith.constant 0 : i32
    %2 = arith.cmpi ne, %1, %c0_i32_0 : i32
    scf.if %2 {
      %cst_16 = arith.constant 0.000000e+00 : f32
      %19 = vector.broadcast %cst_16 : f32 to vector<128x128xf32>
      %c0_17 = arith.constant 0 : index
      %c0_18 = arith.constant 0 : index
      %20 = vector.load %arg7[%c0_17, %c0_18] : memref<128x128xf32, #tpu.memory_space<vmem>>, vector<128x128xf32>
      tpu.vector_store %arg7[%c0_17, %c0_18], %19 {strides = array<i32>} : memref<128x128xf32, #tpu.memory_space<vmem>>, vector<128x128xf32>,
    } else {
    }
    %c0 = arith.constant 0 : index
    %c0_1 = arith.constant 0 : index
    %3 = vector.load %arg2[%c0, %c0_1] : memref<128x32xf32, #tpu.memory_space<vmem>>, vector<128x32xf32>
    %c0_2 = arith.constant 0 : index
    %c0_3 = arith.constant 0 : index
    %4 = vector.load %arg3[%c0_2, %c0_3] : memref<32x32xf32, #tpu.memory_space<vmem>>, vector<32x32xf32>
    %cst = arith.constant dense<0.000000e+00> : vector<128x32xf32>
    %5 = tpu.matmul %3, %4, %cst {dimension_numbers = #tpu.dot_dimension_numbers<[1], [0], [0], [1], [0, 0, 1, 1], [], []>} : vector<128x32xf32>, vector<32x32xf32>, vector<128x32xf32> -> vector<128x32xf32>
    %c0_4 = arith.constant 0 : index
    %c0_5 = arith.constant 0 : index
    %6 = vector.load %arg4[%c0_4, %c0_5] : memref<1x32xf32, #tpu.memory_space<vmem>>, vector<1x32xf32>
    %7 = vector.broadcast %6 : vector<1x32xf32> to vector<128x32xf32>
    %8 = arith.addf %5, %7 : vector<128x32xf32>
    %cst_6 = arith.constant 0.000000e+00 : f32
    %9 = vector.broadcast %cst_6 : f32 to vector<128x32xf32>
    %10 = arith.maximumf %8, %9 : vector<128x32xf32>
    %c0_7 = arith.constant 0 : index
    %c0_8 = arith.constant 0 : index
    %11 = vector.load %arg7[%c0_7, %c0_8] : memref<128x128xf32, #tpu.memory_space<vmem>>, vector<128x128xf32>
    %c0_9 = arith.constant 0 : index
    %c0_10 = arith.constant 0 : index
    %12 = vector.load %arg5[%c0_9, %c0_10] : memref<32x128xf32, #tpu.memory_space<vmem>>, vector<32x128xf32>
    %cst_11 = arith.constant dense<0.000000e+00> : vector<128x128xf32>
    %13 = tpu.matmul %10, %12, %cst_11 {dimension_numbers = #tpu.dot_dimension_numbers<[1], [0], [0], [1], [0, 0, 1, 1], [], []>} : vector<128x32xf32>, vector<32x128xf32>, vector<128x128xf32> -> vector<128x128xf32>
    %14 = arith.addf %11, %13 : vector<128x128xf32>
    %c0_12 = arith.constant 0 : index
    %c0_13 = arith.constant 0 : index
    %15 = vector.load %arg7[%c0_12, %c0_13] : memref<128x128xf32, #tpu.memory_space<vmem>>, vector<128x128xf32>
    tpu.vector_store %arg7[%c0_12, %c0_13], %14 {strides = array<i32>} : memref<128x128xf32, #tpu.memory_space<vmem>>, vector<128x128xf32>,
    %c0_i32_14 = arith.constant 0 : i32
    %16 = arith.cmpi eq, %arg1, %c0_i32_14 : i32
    %17 = arith.extui %16 : i1 to i32
    %c0_i32_15 = arith.constant 0 : i32
    %18 = arith.cmpi ne, %17, %c0_i32_15 : i32
    scf.if %18 {
      %c0_16 = arith.constant 0 : index
      %c0_17 = arith.constant 0 : index
      %19 = vector.load %arg7[%c0_16, %c0_17] : memref<128x128xf32, #tpu.memory_space<vmem>>, vector<128x128xf32>
      %c0_18 = arith.constant 0 : index
      %c0_19 = arith.constant 0 : index
      %20 = vector.load %arg6[%c0_18, %c0_19] : memref<1x128xf32, #tpu.memory_space<vmem>>, vector<1x128xf32>
      %21 = vector.broadcast %20 : vector<1x128xf32> to vector<128x128xf32>
      %22 = arith.addf %19, %21 : vector<128x128xf32>
      %c0_20 = arith.constant 0 : index
      %c0_21 = arith.constant 0 : index
      %23 = vector.load %arg7[%c0_20, %c0_21] : memref<128x128xf32, #tpu.memory_space<vmem>>, vector<128x128xf32>
      tpu.vector_store %arg7[%c0_20, %c0_21], %22 {strides = array<i32>} : memref<128x128xf32, #tpu.memory_space<vmem>>, vector<128x128xf32>,
    } else {
    }
    return
  }
  func.func @transform_0(%arg0: i32, %arg1: i32) -> (i32, i32) {
    %c0_i32 = arith.constant 0 : i32
    %c0_i32_0 = arith.constant 0 : i32
    return %arg0, %c0_i32 : i32, i32
  }
  func.func @transform_1(%arg0: i32, %arg1: i32) -> (i32, i32) {
    %c0_i32 = arith.constant 0 : i32
    %c0_i32_0 = arith.constant 0 : i32
    return %c0_i32, %arg1 : i32, i32
  }
  func.func @transform_2(%arg0: i32, %arg1: i32) -> (i32, i32) {
    %c0_i32 = arith.constant 0 : i32
    %c0_i32_0 = arith.constant 0 : i32
    return %c0_i32, %arg1 : i32, i32
  }
  func.func @transform_3(%arg0: i32, %arg1: i32) -> (i32, i32) {
    %c0_i32 = arith.constant 0 : i32
    %c0_i32_0 = arith.constant 0 : i32
    return %arg1, %c0_i32 : i32, i32
  }
  func.func @transform_4(%arg0: i32, %arg1: i32) -> (i32, i32) {
    %c0_i32 = arith.constant 0 : i32
    %c0_i32_0 = arith.constant 0 : i32
    %c0_i32_1 = arith.constant 0 : i32
    return %c0_i32, %c0_i32_0 : i32, i32
  }
  func.func @transform_5(%arg0: i32, %arg1: i32) -> (i32, i32) {
    %c0_i32 = arith.constant 0 : i32
    %c0_i32_0 = arith.constant 0 : i32
    return %arg0, %c0_i32 : i32, i32
  }
}

</mosaic_0001>

<bundles_post_ra>
// kernel: tpu_custom_call.1
= control target key start
LH: loop header
LB: loop body
LE: loop exit
PB: predicated region body
PF: predicated region fallthrough
CT: control target
= control target key end

     0   :  { %vm68_vm0 = vcmask 261120   ;;  %s907_s0 = inlined_call_operand.vmem [shape: f32[128,32], index: 0, kind: input, shape index: {}]   ;;  %s908_s1 = inlined_call_operand.vmem [shape: f32[32,32], index: 1, kind: input, shape index: {}]   ;;  %s909_s2 = inlined_call_operand.vmem [shape: f32[1,32], index: 2, kind: input, shape index: {}]   ;;  %s910_s3 = inlined_call_operand.vmem [shape: f32[32,128], index: 3, kind: input, shape index: {}]   ;;  %s911_s4 = inlined_call_operand.vmem [shape: f32[1,128], index: 4, kind: input, shape index: {}]   ;;  %s912_s5 = inlined_call_operand.hbm [shape: f32[128,128], index: 5, kind: output, shape index: {}]  }
   0x1   :  { %v60_v0 = vld [vmem:[%s908_s1 + $0x18] sm:$0xff]  ;;  %v59_v1 = vld [vmem:[%s908_s1 + $0x10] sm:$0xff]  ;;  %v41_v2 = vld [vmem:[%s907_s0] sm:$0xff] }
   0x2   :  { %671 = vmatprep.subr.mxu0 %v60_v0  ;;  %v58_v3 = vld [vmem:[%s908_s1 + $0x8] sm:$0xff]  ;;  %679 = vmatprep.mubr.msk.f32.mxu0 %vm68_vm0, %v41_v2  ;;  %v57_v4 = vld [vmem:[%s908_s1] sm:$0xff] }
   0x3   :  { %672 = vmatpush3.msra.mxu0 %v60_v0  ;;  %v42_v5 = vld [vmem:[%s907_s0 + $0x8] sm:$0xff] }
   0x4   :  { %673 = vmatprep.subr.mxu0 %v59_v1 }
   0x5   :  { %674 = vmatpush3.msra.mxu0 %v59_v1 }
   0x6   :  { %675 = vmatprep.subr.mxu0 %v58_v3 }
   0x7   :  { %676 = vmatpush3.msra.mxu0 %v58_v3 }
   0x8   :  { %10 = vsyncpa [#allocation3], 0  ;;  %677 = vmatprep.subr.mxu0 %v57_v4  ;;  %v43_v6 = vld [vmem:[%s907_s0 + $0x10] sm:$0xff]  ;;  %v44_v7 = vld [vmem:[%s907_s0 + $0x18] sm:$0xff] }
   0x9   :  { %678 = vmatpush3.msra.mxu0 %v57_v4  ;;  %v45_v8 = vld [vmem:[%s907_s0 + $0x20] sm:$0xff]  ;;  %v46_v9 = vld [vmem:[%s907_s0 + $0x28] sm:$0xff]  ;;  %v47_v10 = vld [vmem:[%s907_s0 + $0x30] sm:$0xff] }
   0xa   :  { %680 = vmatmul.mubr.msk.f32.vlgmr.msra.gmra.mxu0 %vm68_vm0, %v42_v5  ;;  %v48_v11 = vld [vmem:[%s907_s0 + $0x38] sm:$0xff]  ;;  %v49_v12 = vld [vmem:[%s907_s0 + $0x40] sm:$0xff]  ;;  %v50_v13 = vld [vmem:[%s907_s0 + $0x48] sm:$0xff] }
   0xb   :  { %682 = vmatprep.mubr.msk.f32.mxu0 %vm68_vm0, %v43_v6  ;;  %v51_v14 = vld [vmem:[%s907_s0 + $0x50] sm:$0xff]  ;;  %v52_v15 = vld [vmem:[%s907_s0 + $0x58] sm:$0xff]  ;;  %v53_v16 = vld [vmem:[%s907_s0 + $0x60] sm:$0xff] }
   0xc   :  { %v54_v17 = vld [vmem:[%s907_s0 + $0x68] sm:$0xff]  ;;  %v55_v18 = vld [vmem:[%s907_s0 + $0x70] sm:$0xff]  ;;  %v56_v19 = vld [vmem:[%s907_s0 + $0x78] sm:$0xff] }
   0xd   :  { %v297_v20 = vld [vmem:[%s910_s3 + $0x18] sm:$0xff]  ;;  %v296_v21 = vld [vmem:[%s910_s3 + $0x10] sm:$0xff]  ;;  %v295_v22 = vld [vmem:[%s910_s3 + $0x8] sm:$0xff] }
   0xe   :  { %683 = vmatmul.mubr.msk.f32.gmra.mxu0 %vm68_vm0, %v44_v7  ;;  %703 = vmatprep.subr.mxu1 %v297_v20  ;;  %v294_v23 = vld [vmem:[%s910_s3] sm:$0xff] }
   0xf   :  { %685 = vmatprep.mubr.msk.f32.mxu0 %vm68_vm0, %v45_v8  ;;  %704 = vmatpush3.msra.mxu1 %v297_v20  ;;  %v597_v24 = vld [vmem:[%s909_s2] ss:$0 sm:$0xff] }
  0x10   :  { %705 = vmatprep.subr.mxu1 %v296_v21 }
  0x11   :  { %706 = vmatpush3.msra.mxu1 %v296_v21 }
  0x12   :  { %686 = vmatmul.mubr.msk.f32.gmra.mxu0 %vm68_vm0, %v46_v9  ;;  %707 = vmatprep.subr.mxu1 %v295_v22 }
  0x13   :  { %688 = vmatprep.mubr.msk.f32.mxu0 %vm68_vm0, %v47_v10  ;;  %708 = vmatpush3.msra.mxu1 %v295_v22  ;;  %v630_v10 = vld [vmem:[%s911_s4] ss:$0 sm:$0xff]  ;;  %s761_s4 = smov [#allocation2]  }
  0x14   :  { %709 = vmatprep.subr.mxu1 %v294_v23  ;;  %s586_s15 = sshll.u32 %s761_s4, 4  ;;  %s587_s15 = int_to_ptr.vmem [resolvable:$true] %s586_s15 }
  0x15   :  { %710 = vmatpush3.msra.mxu1 %v294_v23  ;;  %s739_s16 = scalar_lea.vmem %s587_s15, 2048  ;;  %p744_p1 = scmp.lt.s32.totalorder %s587_s15, %s587_s15 }
  0x16   :  { %689 = vmatmul.mubr.msk.f32.gmra.mxu0 %vm68_vm0, %v48_v11  ;;  %p740_p0 = scmp.ne.s32.totalorder %s587_s15, %s739_s16  ;;  %p745_p2 = scmp.lt.s32.totalorder %s739_s16, %s739_s16 }
  0x17   :  { %691 = vmatprep.mubr.msk.f32.mxu0 %vm68_vm0, %v49_v12 }
  0x18   :  { %p746_p3 = por %p745_p2, %p744_p1 }
  0x1a   :  { %692 = vmatmul.mubr.msk.f32.gmra.mxu0 %vm68_vm0, %v50_v13  ;;  %p747_p4 = pnand %p746_p3, %p740_p0 }
  0x1b   :  { %694 = vmatprep.mubr.msk.f32.mxu0 %vm68_vm0, %v51_v14 }
  0x1e   :  { %695 = vmatmul.mubr.msk.f32.gmra.mxu0 %vm68_vm0, %v52_v15 }
  0x1f   :  { %697 = vmatprep.mubr.msk.f32.mxu0 %vm68_vm0, %v53_v16 }
  0x22   :  { %698 = vmatmul.mubr.msk.f32.gmra.mxu0 %vm68_vm0, %v54_v17 }
  0x23   :  { %700 = vmatprep.mubr.msk.f32.mxu0 %vm68_vm0, %v55_v18 }
  0x26   :  { %701 = vmatmul.mubr.msk.f32.gmra.mxu0 %vm68_vm0, %v56_v19 }
  0xca   :  { %v681_v25 = vpop.f32.mrf.mxu0 }
  0xcb   :  { %v189_v26 = vadd.f32 %v681_v25, %v597_v24 }
  0xcc   :  { %v183_v27 = vpop.f32.mrf.mxu0 }
  0xcd   :  { %v184_v28 = vadd.f32 %v597_v24, %v183_v27  ;;  %v263_v31 = vmax.f32 %v189_v26, 0.0 }
  0xce   :  { %v684_v29 = vpop.f32.mrf.mxu0 }
  0xcf   :  { %v262_v30 = vmax.f32 %v184_v28, 0.0  ;;  %v199_v32 = vadd.f32 %v684_v29, %v597_v24 }
  0xd0   :  { %v193_v33 = vpop.f32.mrf.mxu0 }
  0xd1   :  { %v194_v34 = vadd.f32 %v597_v24, %v193_v33  ;;  %711 = vmatprep.mubr.msk.f32.mxu1 %vm68_vm0, %v262_v30  ;;  %v265_v37 = vmax.f32 %v199_v32, 0.0 }
  0xd2   :  { %v687_v35 = vpop.f32.mrf.mxu0  ;;  %712 = vmatmul.mubr.msk.f32.vlgmr.msra.gmra.mxu1 %vm68_vm0, %v263_v31 }
  0xd3   :  { %v264_v36 = vmax.f32 %v194_v34, 0.0  ;;  %v209_v38 = vadd.f32 %v687_v35, %v597_v24 }
  0xd4   :  { %v203_v39 = vpop.f32.mrf.mxu0 }
  0xd5   :  { %v204_v40 = vadd.f32 %v597_v24, %v203_v39  ;;  %714 = vmatprep.mubr.msk.f32.mxu1 %vm68_vm0, %v264_v36  ;;  %v267_v43 = vmax.f32 %v209_v38, 0.0 }
  0xd6   :  { %v690_v41 = vpop.f32.mrf.mxu0  ;;  %715 = vmatmul.mubr.msk.f32.gmra.mxu1 %vm68_vm0, %v265_v37 }
  0xd7   :  { %v266_v42 = vmax.f32 %v204_v40, 0.0  ;;  %v219_v44 = vadd.f32 %v690_v41, %v597_v24 }
  0xd8   :  { %v213_v45 = vpop.f32.mrf.mxu0 }
  0xd9   :  { %v214_v46 = vadd.f32 %v597_v24, %v213_v45  ;;  %717 = vmatprep.mubr.msk.f32.mxu1 %vm68_vm0, %v266_v42  ;;  %v269_v49 = vmax.f32 %v219_v44, 0.0 }
  0xda   :  { %v693_v47 = vpop.f32.mrf.mxu0  ;;  %718 = vmatmul.mubr.msk.f32.gmra.mxu1 %vm68_vm0, %v267_v43 }
  0xdb   :  { %v268_v48 = vmax.f32 %v214_v46, 0.0  ;;  %v229_v50 = vadd.f32 %v693_v47, %v597_v24 }
  0xdc   :  { %v223_v51 = vpop.f32.mrf.mxu0 }
  0xdd   :  { %v224_v52 = vadd.f32 %v597_v24, %v223_v51  ;;  %720 = vmatprep.mubr.msk.f32.mxu1 %vm68_vm0, %v268_v48  ;;  %v271_v55 = vmax.f32 %v229_v50, 0.0 }
  0xde   :  { %v696_v53 = vpop.f32.mrf.mxu0  ;;  %721 = vmatmul.mubr.msk.f32.gmra.mxu1 %vm68_vm0, %v269_v49 }
  0xdf   :  { %v270_v54 = vmax.f32 %v224_v52, 0.0  ;;  %v239_v56 = vadd.f32 %v696_v53, %v597_v24 }
  0xe0   :  { %v233_v57 = vpop.f32.mrf.mxu0 }
  0xe1   :  { %v234_v58 = vadd.f32 %v597_v24, %v233_v57  ;;  %723 = vmatprep.mubr.msk.f32.mxu1 %vm68_vm0, %v270_v54  ;;  %v273_v61 = vmax.f32 %v239_v56, 0.0 }
  0xe2   :  { %v699_v59 = vpop.f32.mrf.mxu0  ;;  %724 = vmatmul.mubr.msk.f32.gmra.mxu1 %vm68_vm0, %v271_v55 }
  0xe3   :  { %v272_v60 = vmax.f32 %v234_v58, 0.0  ;;  %v249_v62 = vadd.f32 %v699_v59, %v597_v24 }
  0xe4   :  { %v243_v63 = vpop.f32.mrf.mxu0 }
  0xe5   :  { %v244_v0 = vadd.f32 %v597_v24, %v243_v63  ;;  %726 = vmatprep.mubr.msk.f32.mxu1 %vm68_vm0, %v272_v60  ;;  %v275_v3 = vmax.f32 %v249_v62, 0.0 }
  0xe6   :  { %v702_v1 = vpop.f32.mrf.mxu0  ;;  %727 = vmatmul.mubr.msk.f32.gmra.mxu1 %vm68_vm0, %v273_v61 }
  0xe7   :  { %v274_v2 = vmax.f32 %v244_v0, 0.0  ;;  %v259_v4 = vadd.f32 %v702_v1, %v597_v24 }
  0xe8   :  { %v253_v5 = vpop.f32.mrf.mxu0 }
  0xe9   :  { %v254_v6 = vadd.f32 %v597_v24, %v253_v5  ;;  %729 = vmatprep.mubr.msk.f32.mxu1 %vm68_vm0, %v274_v2  ;;  %v277_v8 = vmax.f32 %v259_v4, 0.0 }
  0xea   :  { %730 = vmatmul.mubr.msk.f32.gmra.mxu1 %vm68_vm0, %v275_v3 }
  0xeb   :  { %v276_v7 = vmax.f32 %v254_v6, 0.0 }
  0xed   :  { %732 = vmatprep.mubr.msk.f32.mxu1 %vm68_vm0, %v276_v7 }
  0xee   :  { %733 = vmatmul.mubr.msk.f32.gmra.mxu1 %vm68_vm0, %v277_v8 }
 0x192   :  { %v713_v9 = vpop.f32.mrf.mxu1 }
 0x193   :  { %v550_v12 = vadd.f32 %v713_v9, %v630_v10 }
 0x194   :  { %v412_v11 = vpop.f32.mrf.mxu1 }
 0x195   :  { %566 = vst [vmem:[#allocation2 + $0x8] sm:$0xff] %v550_v12  ;;  %v549_v14 = vadd.f32 %v630_v10, %v412_v11 }
 0x196   :  { %v716_v13 = vpop.f32.mrf.mxu1 }
 0x197   :  { %565 = vst [vmem:[#allocation2] sm:$0xff] %v549_v14  ;;  %v552_v16 = vadd.f32 %v716_v13, %v630_v10 }
 0x198   :  { %v422_v15 = vpop.f32.mrf.mxu1 }
 0x199   :  { %568 = vst [vmem:[#allocation2 + $0x18] sm:$0xff] %v552_v16  ;;  %v551_v18 = vadd.f32 %v630_v10, %v422_v15 }
 0x19a   :  { %v719_v17 = vpop.f32.mrf.mxu1 }
 0x19b   :  { %567 = vst [vmem:[#allocation2 + $0x10] sm:$0xff] %v551_v18  ;;  %v554_v20 = vadd.f32 %v719_v17, %v630_v10 }
 0x19c   :  { %v432_v19 = vpop.f32.mrf.mxu1 }
 0x19d   :  { %570 = vst [vmem:[#allocation2 + $0x28] sm:$0xff] %v554_v20  ;;  %v553_v22 = vadd.f32 %v630_v10, %v432_v19 }
 0x19e   :  { %v722_v21 = vpop.f32.mrf.mxu1 }
 0x19f   :  { %569 = vst [vmem:[#allocation2 + $0x20] sm:$0xff] %v553_v22  ;;  %v556_v24 = vadd.f32 %v722_v21, %v630_v10 }
 0x1a0   :  { %v442_v23 = vpop.f32.mrf.mxu1 }
 0x1a1   :  { %572 = vst [vmem:[#allocation2 + $0x38] sm:$0xff] %v556_v24  ;;  %v555_v26 = vadd.f32 %v630_v10, %v442_v23 }
 0x1a2   :  { %v725_v25 = vpop.f32.mrf.mxu1 }
 0x1a3   :  { %571 = vst [vmem:[#allocation2 + $0x30] sm:$0xff] %v555_v26  ;;  %v558_v28 = vadd.f32 %v725_v25, %v630_v10 }
 0x1a4   :  { %v452_v27 = vpop.f32.mrf.mxu1 }
 0x1a5   :  { %574 = vst [vmem:[#allocation2 + $0x48] sm:$0xff] %v558_v28  ;;  %v557_v30 = vadd.f32 %v630_v10, %v452_v27 }
 0x1a6   :  { %v728_v29 = vpop.f32.mrf.mxu1 }
 0x1a7   :  { %573 = vst [vmem:[#allocation2 + $0x40] sm:$0xff] %v557_v30  ;;  %v560_v32 = vadd.f32 %v728_v29, %v630_v10 }
 0x1a8   :  { %v462_v31 = vpop.f32.mrf.mxu1 }
 0x1a9   :  { %576 = vst [vmem:[#allocation2 + $0x58] sm:$0xff] %v560_v32  ;;  %v559_v34 = vadd.f32 %v630_v10, %v462_v31 }
 0x1aa   :  { %v731_v33 = vpop.f32.mrf.mxu1 }
 0x1ab   :  { %575 = vst [vmem:[#allocation2 + $0x50] sm:$0xff] %v559_v34  ;;  %v562_v36 = vadd.f32 %v731_v33, %v630_v10 }
 0x1ac   :  { %v472_v35 = vpop.f32.mrf.mxu1 }
 0x1ad   :  { %578 = vst [vmem:[#allocation2 + $0x68] sm:$0xff] %v562_v36  ;;  %v561_v38 = vadd.f32 %v630_v10, %v472_v35 }
 0x1ae   :  { %v734_v37 = vpop.f32.mrf.mxu1 }
 0x1af   :  { %577 = vst [vmem:[#allocation2 + $0x60] sm:$0xff] %v561_v38  ;;  %v564_v40 = vadd.f32 %v734_v37, %v630_v10 }
 0x1b0   :  { %v482_v39 = vpop.f32.mrf.mxu1 }
 0x1b1   :  { %580 = vst [vmem:[#allocation2 + $0x78] sm:$0xff] %v564_v40  ;;  %v563_v41 = vadd.f32 %v630_v10, %v482_v39 }
 0x1b3   :  { %579 = vst [vmem:[#allocation2 + $0x70] sm:$0xff] %v563_v41 }
 0x1b4   :  { %750 = shalt.err (!%p747_p4)
}
 0x1b5   :  { %s762_s17 = smov 128   ;;  %s763_s18 = smov 8  }
 0x1b6   :  { %592 = dma.vmem_to_hbm [thread:$0]  %s587_s15, 2048, %s912_s5, [#allocation3], %s762_s17, %s762_s17, %s763_s18  }
 0x1b7   :  { %759 = dma.done.wait [#allocation3], 2048  }
 0x1b8   :  { %760 = vsyncadd [#allocation3], 4294965248 }
 0x1b9   :  { %596 = vsyncpa [#allocation3], 1 }

// kernel: tpu_custom_call.1
= control target key start
LH: loop header
LB: loop body
LE: loop exit
PB: predicated region body
PF: predicated region fallthrough
CT: control target
= control target key end

     0   :  { %vm68_vm0 = vcmask 261120   ;;  %s907_s0 = inlined_call_operand.vmem [shape: f32[128,32], index: 0, kind: input, shape index: {}]   ;;  %s908_s1 = inlined_call_operand.vmem [shape: f32[32,32], index: 1, kind: input, shape index: {}]   ;;  %s909_s2 = inlined_call_operand.vmem [shape: f32[1,32], index: 2, kind: input, shape index: {}]   ;;  %s910_s3 = inlined_call_operand.vmem [shape: f32[32,128], index: 3, kind: input, shape index: {}]   ;;  %s911_s4 = inlined_call_operand.vmem [shape: f32[1,128], index: 4, kind: input, shape index: {}]   ;;  %s912_s5 = inlined_call_operand.hbm [shape: f32[128,128], index: 5, kind: output, shape index: {}]  }
   0x1   :  { %v60_v0 = vld [vmem:[%s908_s1 + $0x18] sm:$0xff]  ;;  %v59_v1 = vld [vmem:[%s908_s1 + $0x10] sm:$0xff]  ;;  %v41_v2 = vld [vmem:[%s907_s0] sm:$0xff] }
   0x2   :  { %671 = vmatprep.subr.mxu0 %v60_v0  ;;  %v58_v3 = vld [vmem:[%s908_s1 + $0x8] sm:$0xff]  ;;  %679 = vmatprep.mubr.msk.f32.mxu0 %vm68_vm0, %v41_v2  ;;  %v57_v4 = vld [vmem:[%s908_s1] sm:$0xff] }
   0x3   :  { %672 = vmatpush3.msra.mxu0 %v60_v0  ;;  %v42_v5 = vld [vmem:[%s907_s0 + $0x8] sm:$0xff] }
   0x4   :  { %673 = vmatprep.subr.mxu0 %v59_v1 }
   0x5   :  { %674 = vmatpush3.msra.mxu0 %v59_v1 }
   0x6   :  { %675 = vmatprep.subr.mxu0 %v58_v3 }
   0x7   :  { %676 = vmatpush3.msra.mxu0 %v58_v3 }
   0x8   :  { %10 = vsyncpa [#allocation3], 0  ;;  %677 = vmatprep.subr.mxu0 %v57_v4  ;;  %v43_v6 = vld [vmem:[%s907_s0 + $0x10] sm:$0xff]  ;;  %v44_v7 = vld [vmem:[%s907_s0 + $0x18] sm:$0xff] }
   0x9   :  { %678 = vmatpush3.msra.mxu0 %v57_v4  ;;  %v45_v8 = vld [vmem:[%s907_s0 + $0x20] sm:$0xff]  ;;  %v46_v9 = vld [vmem:[%s907_s0 + $0x28] sm:$0xff]  ;;  %v47_v10 = vld [vmem:[%s907_s0 + $0x30] sm:$0xff] }
   0xa   :  { %680 = vmatmul.mubr.msk.f32.vlgmr.msra.gmra.mxu0 %vm68_vm0, %v42_v5  ;;  %v48_v11 = vld [vmem:[%s907_s0 + $0x38] sm:$0xff]  ;;  %v49_v12 = vld [vmem:[%s907_s0 + $0x40] sm:$0xff]  ;;  %v50_v13 = vld [vmem:[%s907_s0 + $0x48] sm:$0xff] }
   0xb   :  { %682 = vmatprep.mubr.msk.f32.mxu0 %vm68_vm0, %v43_v6  ;;  %v51_v14 = vld [vmem:[%s907_s0 + $0x50] sm:$0xff]  ;;  %v52_v15 = vld [vmem:[%s907_s0 + $0x58] sm:$0xff]  ;;  %v53_v16 = vld [vmem:[%s907_s0 + $0x60] sm:$0xff] }
   0xc   :  { %v54_v17 = vld [vmem:[%s907_s0 + $0x68] sm:$0xff]  ;;  %v55_v18 = vld [vmem:[%s907_s0 + $0x70] sm:$0xff]  ;;  %v56_v19 = vld [vmem:[%s907_s0 + $0x78] sm:$0xff] }
   0xd   :  { %v297_v20 = vld [vmem:[%s910_s3 + $0x18] sm:$0xff]  ;;  %v296_v21 = vld [vmem:[%s910_s3 + $0x10] sm:$0xff]  ;;  %v295_v22 = vld [vmem:[%s910_s3 + $0x8] sm:$0xff] }
   0xe   :  { %683 = vmatmul.mubr.msk.f32.gmra.mxu0 %vm68_vm0, %v44_v7  ;;  %703 = vmatprep.subr.mxu1 %v297_v20  ;;  %v294_v23 = vld [vmem:[%s910_s3] sm:$0xff] }
   0xf   :  { %685 = vmatprep.mubr.msk.f32.mxu0 %vm68_vm0, %v45_v8  ;;  %704 = vmatpush3.msra.mxu1 %v297_v20  ;;  %v597_v24 = vld [vmem:[%s909_s2] ss:$0 sm:$0xff] }
  0x10   :  { %705 = vmatprep.subr.mxu1 %v296_v21 }
  0x11   :  { %706 = vmatpush3.msra.mxu1 %v296_v21 }
  0x12   :  { %686 = vmatmul.mubr.msk.f32.gmra.mxu0 %vm68_vm0, %v46_v9  ;;  %707 = vmatprep.subr.mxu1 %v295_v22 }
  0x13   :  { %688 = vmatprep.mubr.msk.f32.mxu0 %vm68_vm0, %v47_v10  ;;  %708 = vmatpush3.msra.mxu1 %v295_v22  ;;  %v630_v10 = vld [vmem:[%s911_s4] ss:$0 sm:$0xff]  ;;  %s761_s4 = smov [#allocation2]  }
  0x14   :  { %709 = vmatprep.subr.mxu1 %v294_v23  ;;  %s586_s15 = sshll.u32 %s761_s4, 4  ;;  %s587_s15 = int_to_ptr.vmem [resolvable:$true] %s586_s15 }
  0x15   :  { %710 = vmatpush3.msra.mxu1 %v294_v23  ;;  %s739_s16 = scalar_lea.vmem %s587_s15, 2048  ;;  %p744_p1 = scmp.lt.s32.totalorder %s587_s15, %s587_s15 }
  0x16   :  { %689 = vmatmul.mubr.msk.f32.gmra.mxu0 %vm68_vm0, %v48_v11  ;;  %p740_p0 = scmp.ne.s32.totalorder %s587_s15, %s739_s16  ;;  %p745_p2 = scmp.lt.s32.totalorder %s739_s16, %s739_s16 }
  0x17   :  { %691 = vmatprep.mubr.msk.f32.mxu0 %vm68_vm0, %v49_v12 }
  0x18   :  { %p746_p3 = por %p745_p2, %p744_p1 }
  0x1a   :  { %692 = vmatmul.mubr.msk.f32.gmra.mxu0 %vm68_vm0, %v50_v13  ;;  %p747_p4 = pnand %p746_p3, %p740_p0 }
  0x1b   :  { %694 = vmatprep.mubr.msk.f32.mxu0 %vm68_vm0, %v51_v14 }
  0x1e   :  { %695 = vmatmul.mubr.msk.f32.gmra.mxu0 %vm68_vm0, %v52_v15 }
  0x1f   :  { %697 = vmatprep.mubr.msk.f32.mxu0 %vm68_vm0, %v53_v16 }
  0x22   :  { %698 = vmatmul.mubr.msk.f32.gmra.mxu0 %vm68_vm0, %v54_v17 }
  0x23   :  { %700 = vmatprep.mubr.msk.f32.mxu0 %vm68_vm0, %v55_v18 }
  0x26   :  { %701 = vmatmul.mubr.msk.f32.gmra.mxu0 %vm68_vm0, %v56_v19 }
  0xca   :  { %v681_v25 = vpop.f32.mrf.mxu0 }
  0xcb   :  { %v189_v26 = vadd.f32 %v681_v25, %v597_v24 }
  0xcc   :  { %v183_v27 = vpop.f32.mrf.mxu0 }
  0xcd   :  { %v184_v28 = vadd.f32 %v597_v24, %v183_v27  ;;  %v263_v31 = vmax.f32 %v189_v26, 0.0 }
  0xce   :  { %v684_v29 = vpop.f32.mrf.mxu0 }
  0xcf   :  { %v262_v30 = vmax.f32 %v184_v28, 0.0  ;;  %v199_v32 = vadd.f32 %v684_v29, %v597_v24 }
  0xd0   :  { %v193_v33 = vpop.f32.mrf.mxu0 }
  0xd1   :  { %v194_v34 = vadd.f32 %v597_v24, %v193_v33  ;;  %711 = vmatprep.mubr.msk.f32.mxu1 %vm68_vm0, %v262_v30  ;;  %v265_v37 = vmax.f32 %v199_v32, 0.0 }
  0xd2   :  { %v687_v35 = vpop.f32.mrf.mxu0  ;;  %712 = vmatmul.mubr.msk.f32.vlgmr.msra.gmra.mxu1 %vm68_vm0, %v263_v31 }
  0xd3   :  { %v264_v36 = vmax.f32 %v194_v34, 0.0  ;;  %v209_v38 = vadd.f32 %v687_v35, %v597_v24 }
  0xd4   :  { %v203_v39 = vpop.f32.mrf.mxu0 }
  0xd5   :  { %v204_v40 = vadd.f32 %v597_v24, %v203_v39  ;;  %714 = vmatprep.mubr.msk.f32.mxu1 %vm68_vm0, %v264_v36  ;;  %v267_v43 = vmax.f32 %v209_v38, 0.0 }
  0xd6   :  { %v690_v41 = vpop.f32.mrf.mxu0  ;;  %715 = vmatmul.mubr.msk.f32.gmra.mxu1 %vm68_vm0, %v265_v37 }
  0xd7   :  { %v266_v42 = vmax.f32 %v204_v40, 0.0  ;;  %v219_v44 = vadd.f32 %v690_v41, %v597_v24 }
  0xd8   :  { %v213_v45 = vpop.f32.mrf.mxu0 }
  0xd9   :  { %v214_v46 = vadd.f32 %v597_v24, %v213_v45  ;;  %717 = vmatprep.mubr.msk.f32.mxu1 %vm68_vm0, %v266_v42  ;;  %v269_v49 = vmax.f32 %v219_v44, 0.0 }
  0xda   :  { %v693_v47 = vpop.f32.mrf.mxu0  ;;  %718 = vmatmul.mubr.msk.f32.gmra.mxu1 %vm68_vm0, %v267_v43 }
  0xdb   :  { %v268_v48 = vmax.f32 %v214_v46, 0.0  ;;  %v229_v50 = vadd.f32 %v693_v47, %v597_v24 }
  0xdc   :  { %v223_v51 = vpop.f32.mrf.mxu0 }
  0xdd   :  { %v224_v52 = vadd.f32 %v597_v24, %v223_v51  ;;  %720 = vmatprep.mubr.msk.f32.mxu1 %vm68_vm0, %v268_v48  ;;  %v271_v55 = vmax.f32 %v229_v50, 0.0 }
  0xde   :  { %v696_v53 = vpop.f32.mrf.mxu0  ;;  %721 = vmatmul.mubr.msk.f32.gmra.mxu1 %vm68_vm0, %v269_v49 }
  0xdf   :  { %v270_v54 = vmax.f32 %v224_v52, 0.0  ;;  %v239_v56 = vadd.f32 %v696_v53, %v597_v24 }
  0xe0   :  { %v233_v57 = vpop.f32.mrf.mxu0 }
  0xe1   :  { %v234_v58 = vadd.f32 %v597_v24, %v233_v57  ;;  %723 = vmatprep.mubr.msk.f32.mxu1 %vm68_vm0, %v270_v54  ;;  %v273_v61 = vmax.f32 %v239_v56, 0.0 }
  0xe2   :  { %v699_v59 = vpop.f32.mrf.mxu0  ;;  %724 = vmatmul.mubr.msk.f32.gmra.mxu1 %vm68_vm0, %v271_v55 }
  0xe3   :  { %v272_v60 = vmax.f32 %v234_v58, 0.0  ;;  %v249_v62 = vadd.f32 %v699_v59, %v597_v24 }
  0xe4   :  { %v243_v63 = vpop.f32.mrf.mxu0 }
  0xe5   :  { %v244_v0 = vadd.f32 %v597_v24, %v243_v63  ;;  %726 = vmatprep.mubr.msk.f32.mxu1 %vm68_vm0, %v272_v60  ;;  %v275_v3 = vmax.f32 %v249_v62, 0.0 }
  0xe6   :  { %v702_v1 = vpop.f32.mrf.mxu0  ;;  %727 = vmatmul.mubr.msk.f32.gmra.mxu1 %vm68_vm0, %v273_v61 }
  0xe7   :  { %v274_v2 = vmax.f32 %v244_v0, 0.0  ;;  %v259_v4 = vadd.f32 %v702_v1, %v597_v24 }
  0xe8   :  { %v253_v5 = vpop.f32.mrf.mxu0 }
  0xe9   :  { %v254_v6 = vadd.f32 %v597_v24, %v253_v5  ;;  %729 = vmatprep.mubr.msk.f32.mxu1 %vm68_vm0, %v274_v2  ;;  %v277_v8 = vmax.f32 %v259_v4, 0.0 }
  0xea   :  { %730 = vmatmul.mubr.msk.f32.gmra.mxu1 %vm68_vm0, %v275_v3 }
  0xeb   :  { %v276_v7 = vmax.f32 %v254_v6, 0.0 }
  0xed   :  { %732 = vmatprep.mubr.msk.f32.mxu1 %vm68_vm0, %v276_v7 }
  0xee   :  { %733 = vmatmul.mubr.msk.f32.gmra.mxu1 %vm68_vm0, %v277_v8 }
 0x192   :  { %v713_v9 = vpop.f32.mrf.mxu1 }
 0x193   :  { %v550_v12 = vadd.f32 %v713_v9, %v630_v10 }
 0x194   :  { %v412_v11 = vpop.f32.mrf.mxu1 }
 0x195   :  { %566 = vst [vmem:[#allocation2 + $0x8] sm:$0xff] %v550_v12  ;;  %v549_v14 = vadd.f32 %v630_v10, %v412_v11 }
 0x196   :  { %v716_v13 = vpop.f32.mrf.mxu1 }
 0x197   :  { %565 = vst [vmem:[#allocation2] sm:$0xff] %v549_v14  ;;  %v552_v16 = vadd.f32 %v716_v13, %v630_v10 }
 0x198   :  { %v422_v15 = vpop.f32.mrf.mxu1 }
 0x199   :  { %568 = vst [vmem:[#allocation2 + $0x18] sm:$0xff] %v552_v16  ;;  %v551_v18 = vadd.f32 %v630_v10, %v422_v15 }
 0x19a   :  { %v719_v17 = vpop.f32.mrf.mxu1 }
 0x19b   :  { %567 = vst [vmem:[#allocation2 + $0x10] sm:$0xff] %v551_v18  ;;  %v554_v20 = vadd.f32 %v719_v17, %v630_v10 }
 0x19c   :  { %v432_v19 = vpop.f32.mrf.mxu1 }
 0x19d   :  { %570 = vst [vmem:[#allocation2 + $0x28] sm:$0xff] %v554_v20  ;;  %v553_v22 = vadd.f32 %v630_v10, %v432_v19 }
 0x19e   :  { %v722_v21 = vpop.f32.mrf.mxu1 }
 0x19f   :  { %569 = vst [vmem:[#allocation2 + $0x20] sm:$0xff] %v553_v22  ;;  %v556_v24 = vadd.f32 %v722_v21, %v630_v10 }
 0x1a0   :  { %v442_v23 = vpop.f32.mrf.mxu1 }
 0x1a1   :  { %572 = vst [vmem:[#allocation2 + $0x38] sm:$0xff] %v556_v24  ;;  %v555_v26 = vadd.f32 %v630_v10, %v442_v23 }
 0x1a2   :  { %v725_v25 = vpop.f32.mrf.mxu1 }
 0x1a3   :  { %571 = vst [vmem:[#allocation2 + $0x30] sm:$0xff] %v555_v26  ;;  %v558_v28 = vadd.f32 %v725_v25, %v630_v10 }
 0x1a4   :  { %v452_v27 = vpop.f32.mrf.mxu1 }
 0x1a5   :  { %574 = vst [vmem:[#allocation2 + $0x48] sm:$0xff] %v558_v28  ;;  %v557_v30 = vadd.f32 %v630_v10, %v452_v27 }
 0x1a6   :  { %v728_v29 = vpop.f32.mrf.mxu1 }
 0x1a7   :  { %573 = vst [vmem:[#allocation2 + $0x40] sm:$0xff] %v557_v30  ;;  %v560_v32 = vadd.f32 %v728_v29, %v630_v10 }
 0x1a8   :  { %v462_v31 = vpop.f32.mrf.mxu1 }
 0x1a9   :  { %576 = vst [vmem:[#allocation2 + $0x58] sm:$0xff] %v560_v32  ;;  %v559_v34 = vadd.f32 %v630_v10, %v462_v31 }
 0x1aa   :  { %v731_v33 = vpop.f32.mrf.mxu1 }
 0x1ab   :  { %575 = vst [vmem:[#allocation2 + $0x50] sm:$0xff] %v559_v34  ;;  %v562_v36 = vadd.f32 %v731_v33, %v630_v10 }
 0x1ac   :  { %v472_v35 = vpop.f32.mrf.mxu1 }
 0x1ad   :  { %578 = vst [vmem:[#allocation2 + $0x68] sm:$0xff] %v562_v36  ;;  %v561_v38 = vadd.f32 %v630_v10, %v472_v35 }
 0x1ae   :  { %v734_v37 = vpop.f32.mrf.mxu1 }
 0x1af   :  { %577 = vst [vmem:[#allocation2 + $0x60] sm:$0xff] %v561_v38  ;;  %v564_v40 = vadd.f32 %v734_v37, %v630_v10 }
 0x1b0   :  { %v482_v39 = vpop.f32.mrf.mxu1 }
 0x1b1   :  { %580 = vst [vmem:[#allocation2 + $0x78] sm:$0xff] %v564_v40  ;;  %v563_v41 = vadd.f32 %v630_v10, %v482_v39 }
 0x1b3   :  { %579 = vst [vmem:[#allocation2 + $0x70] sm:$0xff] %v563_v41 }
 0x1b4   :  { %750 = shalt.err (!%p747_p4)
}
 0x1b5   :  { %s762_s17 = smov 128   ;;  %s763_s18 = smov 8  }
 0x1b6   :  { %592 = dma.vmem_to_hbm [thread:$0]  %s587_s15, 2048, %s912_s5, [#allocation3], %s762_s17, %s762_s17, %s763_s18  }
 0x1b7   :  { %759 = dma.done.wait [#allocation3], 2048  }
 0x1b8   :  { %760 = vsyncadd [#allocation3], 4294965248 }
 0x1b9   :  { %596 = vsyncpa [#allocation3], 1 }

</bundles_post_ra>
